<compile_context>
chip_gen: v7x
topology: tpu7x:2x2x1
jax: 0.10.0
libtpu: 0.0.40
codegen_flags: <defaults>
</compile_context>

<pallas_src>
import functools

import jax
import jax.numpy as jnp
from jax import lax
from jax.experimental import pallas as pl
from jax.experimental.pallas import tpu as pltpu


_TARGET_ROWS = 1024   # target M rows (B_TILE * TL) per grid step
_MAX_TL = 512         # cap on the sequence tile


def _round_up(a, m):
    return (a + m - 1) // m * m


def _pad_last(a, to):
    return jnp.pad(a, [(0, 0)] * (a.ndim - 1) + [(0, to - a.shape[-1])])


def _fc_motif_kernel(num_layers,
                     x_ref, w_in_ref,
                     scale1_ref, shift1_ref, w1_ref,
                     scale2_ref, shift2_ref, w2_ref,
                     fbias_ref, w_out_ref, b_out_ref, o_ref):
    """One grid step: (B_TILE, TL, K_pad) -> (B_TILE, TL, C_out_pad)."""
    bt, tl, k_pad = x_ref.shape
    co_pad = o_ref.shape[2]
    m = bt * tl

    # ---- proj_in: im2col'd width-tap conv == single (M, K) @ (K, C) matmul.
    xm = x_ref[...].reshape(m, k_pad)               # tile-aligned, layout-free
    h = jnp.dot(xm, w_in_ref[...], preferred_element_type=jnp.float32)

    # ---- compute: num_layers x ResidualUnit(l=C_comp, w=1, ar=1)
    #      (BN folded to affine; conv biases folded into shifts in the wrapper)
    def layer_body(layer, h):
        a1 = jnp.maximum(h * scale1_ref[layer] + shift1_ref[layer], 0.0)
        c1 = jnp.dot(a1, w1_ref[layer], preferred_element_type=jnp.float32)
        a2 = jnp.maximum(c1 * scale2_ref[layer] + shift2_ref[layer], 0.0)
        c2 = jnp.dot(a2, w2_ref[layer], preferred_element_type=jnp.float32)
        return h + c2

    if num_layers <= 4:
        for layer in range(num_layers):             # static unroll (small nl)
            h = layer_body(layer, h)
    else:
        h = lax.fori_loop(0, num_layers, layer_body, h)   # bounds live ranges

    # ---- folded residual bias + attn (ReLU) + proj_out (1x1 conv)
    h = jnp.maximum(h + fbias_ref[...], 0.0)
    out = jnp.dot(h, w_out_ref[...], preferred_element_type=jnp.float32)
    out = out + b_out_ref[...]
    o_ref[...] = out.reshape(bt, tl, co_pad).astype(o_ref.dtype)


def fc_motif_feature_extractor(x, params, *, width, num_compute_layers):
    """x: (N, L, C_in) float32 -> (N, L, hidden_channels) float32."""
    assert width % 2 == 1
    assert num_compute_layers >= 1
    N, L, c_in = x.shape
    c_comp = params["w_in"].shape[2]
    c_out = params["w_out"].shape[1]
    nl = num_compute_layers

    # ---- wrapper-side im2col (zero padding at the L edges, like Conv1d)
    pad = width // 2
    x_zp = jnp.pad(x, ((0, 0), (pad, pad), (0, 0)))
    x_unf = jnp.concatenate([x_zp[:, k:k + L, :] for k in range(width)],
                            axis=-1)                         # (N, L, width*C_in)
    k_in = width * c_in

    # ---- lane-dense channel padding (multiples of 128)
    k_pad = _round_up(k_in, 128)
    c_pad = _round_up(c_comp, 128)
    co_pad = _round_up(c_out, 128)

    # ---- tile selection: fold batch & sequence into the matmul M dimension,
    #      keep the per-step working set small enough for default scoped VMEM.
    TL = min(_round_up(L, 8), _MAX_TL)
    L_p = _round_up(L, TL)
    B_TILE = max(1, min(N, max(1, _TARGET_ROWS // TL)))
    N_p = _round_up(N, B_TILE)

    x_unf = jnp.pad(x_unf,
                    ((0, N_p - N), (0, L_p - L), (0, k_pad - k_in)))

    # ---- fold conv biases into the BN affines (pure parameter preprocessing)
    scale1, shift1 = params["scale1"], params["shift1"]      # (nl, 1, c_comp)
    scale2, shift2 = params["scale2"], params["shift2"]
    b1, b2, b_in = params["b1"], params["b2"], params["b_in"]

    b2_cum = jnp.cumsum(b2, axis=0)                                   # (nl,1,c)
    b2_prev = jnp.concatenate([jnp.zeros_like(b2[:1]), b2_cum[:-1]], axis=0)
    run_bias = b_in[None] + b2_prev                                   # B_l
    shift1_f = shift1 + scale1 * run_bias
    shift2_f = shift2 + scale2 * b1
    final_bias = b_in + b2_cum[-1]                                    # (1, c)

    # ---- pad parameters to lane-dense shapes (zeros keep padded chans inert)
    w_in_p = jnp.pad(params["w_in"].reshape(k_in, c_comp),
                     ((0, k_pad - k_in), (0, c_pad - c_comp)))
    w1_p = jnp.pad(params["w1"],
                   ((0, 0), (0, c_pad - c_comp), (0, c_pad - c_comp)))
    w2_p = jnp.pad(params["w2"],
                   ((0, 0), (0, c_pad - c_comp), (0, c_pad - c_comp)))
    scale1_p = _pad_last(scale1, c_pad)
    shift1_p = _pad_last(shift1_f, c_pad)
    scale2_p = _pad_last(scale2, c_pad)
    shift2_p = _pad_last(shift2_f, c_pad)
    fbias_p = _pad_last(final_bias, c_pad)
    w_out_p = jnp.pad(params["w_out"],
                      ((0, c_pad - c_comp), (0, co_pad - c_out)))
    b_out_p = _pad_last(params["b_out"], co_pad)

    kernel = functools.partial(_fc_motif_kernel, nl)

    def const_spec(a):
        nd = a.ndim
        return pl.BlockSpec(a.shape, lambda bi, li, nd=nd: (0,) * nd)

    in_specs = [
        pl.BlockSpec((B_TILE, TL, k_pad), lambda bi, li: (bi, li, 0)),
        const_spec(w_in_p),
        const_spec(scale1_p), const_spec(shift1_p), const_spec(w1_p),
        const_spec(scale2_p), const_spec(shift2_p), const_spec(w2_p),
        const_spec(fbias_p), const_spec(w_out_p), const_spec(b_out_p),
    ]

    out_full = pl.pallas_call(
        kernel,
        out_shape=jax.ShapeDtypeStruct((N_p, L_p, co_pad), x.dtype),
        grid=(N_p // B_TILE, L_p // TL),
        in_specs=in_specs,
        out_specs=pl.BlockSpec((B_TILE, TL, co_pad), lambda bi, li: (bi, li, 0)),
        compiler_params=pltpu.CompilerParams(
            dimension_semantics=("parallel", "parallel")),
    )(x_unf, w_in_p, scale1_p, shift1_p, w1_p,
      scale2_p, shift2_p, w2_p, fbias_p, w_out_p, b_out_p)

    return out_full[:N, :L, :c_out]


def init_params(key, input_channels, extra_compute, hidden_channels,
                width, num_compute_layers):
    """Deterministic synthetic parameters (shapes from the module __init__)."""
    assert width % 2 == 1
    c_comp = hidden_channels * extra_compute
    ks = jax.random.split(key, 14)

    def u(k, shape, scale=0.1):
        return jax.random.uniform(k, shape, jnp.float32, -scale, scale)

    nl = num_compute_layers
    return dict(
        # proj_in: Conv1d(C_in, C_comp, width); ours[k, i, o] == torch[o, i, k]
        w_in=u(ks[0], (width, input_channels, c_comp)),
        b_in=u(ks[1], (1, c_comp)),
        # ResidualUnit BN folded to per-channel affine (eval mode)
        scale1=1.0 + u(ks[2], (nl, 1, c_comp)),
        shift1=u(ks[3], (nl, 1, c_comp)),
        w1=u(ks[4], (nl, c_comp, c_comp)),
        b1=u(ks[5], (nl, 1, c_comp)),
        scale2=1.0 + u(ks[6], (nl, 1, c_comp)),
        shift2=u(ks[7], (nl, 1, c_comp)),
        w2=u(ks[8], (nl, c_comp, c_comp)),
        b2=u(ks[9], (nl, 1, c_comp)),
        # proj_out: Conv1d(C_comp, hidden_channels, 1)
        w_out=u(ks[10], (c_comp, hidden_channels)),
        b_out=u(ks[11], (1, hidden_channels)),
    )


def reference(x, params, *, width, num_compute_layers):
    """Pure-JAX reference with the ORIGINAL (unfolded, unpadded) formulation."""
    pad = width // 2
    L = x.shape[1]
    x_pad = jnp.pad(x, ((0, 0), (pad, pad), (0, 0)))
    c_comp = params["w_in"].shape[2]
    h = jnp.zeros((x.shape[0], L, c_comp), jnp.float32)
    for k in range(width):
        h = h + jnp.einsum("nlc,co->nlo", x_pad[:, k:k + L, :], params["w_in"][k])
    h = h + params["b_in"][None]
    for layer in range(num_compute_layers):
        a1 = jnp.maximum(h * params["scale1"][layer][None]
                         + params["shift1"][layer][None], 0.0)
        c1 = jnp.einsum("nlc,co->nlo", a1, params["w1"][layer]) + params["b1"][layer][None]
        a2 = jnp.maximum(c1 * params["scale2"][layer][None]
                         + params["shift2"][layer][None], 0.0)
        c2 = jnp.einsum("nlc,co->nlo", a2, params["w2"][layer]) + params["b2"][layer][None]
        h = h + c2
    h = jnp.maximum(h, 0.0)
    return jnp.einsum("nlc,co->nlo", h, params["w_out"]) + params["b_out"][None]


if __name__ == "__main__":
    # Small config: FCMotifFeatureExtractor(input_channels=8, extra_compute=2,
    #                                       hidden_channels=16, width=5,
    #                                       num_compute_layers=2)
    N, L = 2, 16
    input_channels, extra_compute, hidden_channels = 8, 2, 16
    width, num_compute_layers = 5, 2

    key = jax.random.PRNGKey(0)
    kx, kp = jax.random.split(key)
    x = jax.random.normal(kx, (N, L, input_channels), jnp.float32)
    params = init_params(kp, input_channels, extra_compute, hidden_channels,
                         width, num_compute_layers)

    out = fc_motif_feature_extractor(x, params, width=width,
                                     num_compute_layers=num_compute_layers)
    out = jax.block_until_ready(out)

    ref = reference(x, params, width=width, num_compute_layers=num_compute_layers)
    assert out.shape == (N, L, hidden_channels), out.shape
    err = float(jnp.max(jnp.abs(out - ref)))
    assert jnp.allclose(out, ref, atol=1e-3, rtol=1e-3), err

    print("KERNEL_OK")
</pallas_src>

<mosaic_0001>
module attributes {stable_mosaic.version = 11 : i64} {
  func.func @_fc_motif_kernel(%arg0: i32, %arg1: i32, %arg2: memref<2x16x128xf32, #tpu.memory_space<vmem>>, %arg3: memref<128x128xf32, #tpu.memory_space<vmem>>, %arg4: memref<2x1x128xf32, #tpu.memory_space<vmem>>, %arg5: memref<2x1x128xf32, #tpu.memory_space<vmem>>, %arg6: memref<2x128x128xf32, #tpu.memory_space<vmem>>, %arg7: memref<2x1x128xf32, #tpu.memory_space<vmem>>, %arg8: memref<2x1x128xf32, #tpu.memory_space<vmem>>, %arg9: memref<2x128x128xf32, #tpu.memory_space<vmem>>, %arg10: memref<1x128xf32, #tpu.memory_space<vmem>>, %arg11: memref<128x128xf32, #tpu.memory_space<vmem>>, %arg12: memref<1x128xf32, #tpu.memory_space<vmem>>, %arg13: memref<2x16x128xf32, #tpu.memory_space<vmem>>) attributes {dimension_semantics = [#tpu.dimension_semantics<parallel>, #tpu.dimension_semantics<parallel>], iteration_bounds = array<i64: 1, 1>, scalar_prefetch = 0 : i64, scratch_operands = 0 : i64, tpu.core_type = #tpu.core_type<tc>, window_params = [{transform_indices = @transform_0, window_bounds = array<i64: 2, 16, 128>}, {pipeline_mode = #tpu.pipeline_mode<synchronous>, transform_indices = @transform_1, window_bounds = array<i64: 128, 128>}, {pipeline_mode = #tpu.pipeline_mode<synchronous>, transform_indices = @transform_2, window_bounds = array<i64: 2, 1, 128>}, {pipeline_mode = #tpu.pipeline_mode<synchronous>, transform_indices = @transform_3, window_bounds = array<i64: 2, 1, 128>}, {pipeline_mode = #tpu.pipeline_mode<synchronous>, transform_indices = @transform_4, window_bounds = array<i64: 2, 128, 128>}, {pipeline_mode = #tpu.pipeline_mode<synchronous>, transform_indices = @transform_5, window_bounds = array<i64: 2, 1, 128>}, {pipeline_mode = #tpu.pipeline_mode<synchronous>, transform_indices = @transform_6, window_bounds = array<i64: 2, 1, 128>}, {pipeline_mode = #tpu.pipeline_mode<synchronous>, transform_indices = @transform_7, window_bounds = array<i64: 2, 128, 128>}, {pipeline_mode = #tpu.pipeline_mode<synchronous>, transform_indices = @transform_8, window_bounds = array<i64: 1, 128>}, {pipeline_mode = #tpu.pipeline_mode<synchronous>, transform_indices = @transform_9, window_bounds = array<i64: 128, 128>}, {pipeline_mode = #tpu.pipeline_mode<synchronous>, transform_indices = @transform_10, window_bounds = array<i64: 1, 128>}, {transform_indices = @transform_11, window_bounds = array<i64: 2, 16, 128>}]} {
    %c0 = arith.constant 0 : index
    %c0_0 = arith.constant 0 : index
    %c0_1 = arith.constant 0 : index
    %0 = vector.load %arg2[%c0, %c0_0, %c0_1] : memref<2x16x128xf32, #tpu.memory_space<vmem>>, vector<2x16x128xf32>
    %1 = vector.shape_cast %0 : vector<2x16x128xf32> to vector<32x128xf32>
    %c0_2 = arith.constant 0 : index
    %c0_3 = arith.constant 0 : index
    %2 = vector.load %arg3[%c0_2, %c0_3] : memref<128x128xf32, #tpu.memory_space<vmem>>, vector<128x128xf32>
    %cst = arith.constant dense<0.000000e+00> : vector<32x128xf32>
    %3 = tpu.matmul %1, %2, %cst {dimension_numbers = #tpu.dot_dimension_numbers<[1], [0], [0], [1], [0, 0, 1, 1], [], []>} : vector<32x128xf32>, vector<128x128xf32>, vector<32x128xf32> -> vector<32x128xf32>
    %c0_4 = arith.constant 0 : index
    %c0_5 = arith.constant 0 : index
    %c0_6 = arith.constant 0 : index
    %4 = vector.load %arg4[%c0_4, %c0_5, %c0_6] : memref<2x1x128xf32, #tpu.memory_space<vmem>>, vector<1x1x128xf32>
    %5 = vector.shape_cast %4 : vector<1x1x128xf32> to vector<1x128xf32>
    %6 = vector.broadcast %5 : vector<1x128xf32> to vector<32x128xf32>
    %7 = arith.mulf %3, %6 : vector<32x128xf32>
    %c0_7 = arith.constant 0 : index
    %c0_8 = arith.constant 0 : index
    %c0_9 = arith.constant 0 : index
    %8 = vector.load %arg5[%c0_7, %c0_8, %c0_9] : memref<2x1x128xf32, #tpu.memory_space<vmem>>, vector<1x1x128xf32>
    %9 = vector.shape_cast %8 : vector<1x1x128xf32> to vector<1x128xf32>
    %10 = vector.broadcast %9 : vector<1x128xf32> to vector<32x128xf32>
    %11 = arith.addf %7, %10 : vector<32x128xf32>
    %cst_10 = arith.constant 0.000000e+00 : f32
    %12 = vector.broadcast %cst_10 : f32 to vector<32x128xf32>
    %13 = arith.maximumf %11, %12 : vector<32x128xf32>
    %c0_11 = arith.constant 0 : index
    %c0_12 = arith.constant 0 : index
    %c0_13 = arith.constant 0 : index
    %14 = vector.load %arg6[%c0_11, %c0_12, %c0_13] : memref<2x128x128xf32, #tpu.memory_space<vmem>>, vector<1x128x128xf32>
    %15 = vector.shape_cast %14 : vector<1x128x128xf32> to vector<128x128xf32>
    %cst_14 = arith.constant dense<0.000000e+00> : vector<32x128xf32>
    %16 = tpu.matmul %13, %15, %cst_14 {dimension_numbers = #tpu.dot_dimension_numbers<[1], [0], [0], [1], [0, 0, 1, 1], [], []>} : vector<32x128xf32>, vector<128x128xf32>, vector<32x128xf32> -> vector<32x128xf32>
    %c0_15 = arith.constant 0 : index
    %c0_16 = arith.constant 0 : index
    %c0_17 = arith.constant 0 : index
    %17 = vector.load %arg7[%c0_15, %c0_16, %c0_17] : memref<2x1x128xf32, #tpu.memory_space<vmem>>, vector<1x1x128xf32>
    %18 = vector.shape_cast %17 : vector<1x1x128xf32> to vector<1x128xf32>
    %19 = vector.broadcast %18 : vector<1x128xf32> to vector<32x128xf32>
    %20 = arith.mulf %16, %19 : vector<32x128xf32>
    %c0_18 = arith.constant 0 : index
    %c0_19 = arith.constant 0 : index
    %c0_20 = arith.constant 0 : index
    %21 = vector.load %arg8[%c0_18, %c0_19, %c0_20] : memref<2x1x128xf32, #tpu.memory_space<vmem>>, vector<1x1x128xf32>
    %22 = vector.shape_cast %21 : vector<1x1x128xf32> to vector<1x128xf32>
    %23 = vector.broadcast %22 : vector<1x128xf32> to vector<32x128xf32>
    %24 = arith.addf %20, %23 : vector<32x128xf32>
    %cst_21 = arith.constant 0.000000e+00 : f32
    %25 = vector.broadcast %cst_21 : f32 to vector<32x128xf32>
    %26 = arith.maximumf %24, %25 : vector<32x128xf32>
    %c0_22 = arith.constant 0 : index
    %c0_23 = arith.constant 0 : index
    %c0_24 = arith.constant 0 : index
    %27 = vector.load %arg9[%c0_22, %c0_23, %c0_24] : memref<2x128x128xf32, #tpu.memory_space<vmem>>, vector<1x128x128xf32>
    %28 = vector.shape_cast %27 : vector<1x128x128xf32> to vector<128x128xf32>
    %cst_25 = arith.constant dense<0.000000e+00> : vector<32x128xf32>
    %29 = tpu.matmul %26, %28, %cst_25 {dimension_numbers = #tpu.dot_dimension_numbers<[1], [0], [0], [1], [0, 0, 1, 1], [], []>} : vector<32x128xf32>, vector<128x128xf32>, vector<32x128xf32> -> vector<32x128xf32>
    %30 = arith.addf %3, %29 : vector<32x128xf32>
    %c1 = arith.constant 1 : index
    %c0_26 = arith.constant 0 : index
    %c0_27 = arith.constant 0 : index
    %31 = vector.load %arg4[%c1, %c0_26, %c0_27] : memref<2x1x128xf32, #tpu.memory_space<vmem>>, vector<1x1x128xf32>
    %32 = vector.shape_cast %31 : vector<1x1x128xf32> to vector<1x128xf32>
    %33 = vector.broadcast %32 : vector<1x128xf32> to vector<32x128xf32>
    %34 = arith.mulf %30, %33 : vector<32x128xf32>
    %c1_28 = arith.constant 1 : index
    %c0_29 = arith.constant 0 : index
    %c0_30 = arith.constant 0 : index
    %35 = vector.load %arg5[%c1_28, %c0_29, %c0_30] : memref<2x1x128xf32, #tpu.memory_space<vmem>>, vector<1x1x128xf32>
    %36 = vector.shape_cast %35 : vector<1x1x128xf32> to vector<1x128xf32>
    %37 = vector.broadcast %36 : vector<1x128xf32> to vector<32x128xf32>
    %38 = arith.addf %34, %37 : vector<32x128xf32>
    %cst_31 = arith.constant 0.000000e+00 : f32
    %39 = vector.broadcast %cst_31 : f32 to vector<32x128xf32>
    %40 = arith.maximumf %38, %39 : vector<32x128xf32>
    %c1_32 = arith.constant 1 : index
    %c0_33 = arith.constant 0 : index
    %c0_34 = arith.constant 0 : index
    %41 = vector.load %arg6[%c1_32, %c0_33, %c0_34] : memref<2x128x128xf32, #tpu.memory_space<vmem>>, vector<1x128x128xf32>
    %42 = vector.shape_cast %41 : vector<1x128x128xf32> to vector<128x128xf32>
    %cst_35 = arith.constant dense<0.000000e+00> : vector<32x128xf32>
    %43 = tpu.matmul %40, %42, %cst_35 {dimension_numbers = #tpu.dot_dimension_numbers<[1], [0], [0], [1], [0, 0, 1, 1], [], []>} : vector<32x128xf32>, vector<128x128xf32>, vector<32x128xf32> -> vector<32x128xf32>
    %c1_36 = arith.constant 1 : index
    %c0_37 = arith.constant 0 : index
    %c0_38 = arith.constant 0 : index
    %44 = vector.load %arg7[%c1_36, %c0_37, %c0_38] : memref<2x1x128xf32, #tpu.memory_space<vmem>>, vector<1x1x128xf32>
    %45 = vector.shape_cast %44 : vector<1x1x128xf32> to vector<1x128xf32>
    %46 = vector.broadcast %45 : vector<1x128xf32> to vector<32x128xf32>
    %47 = arith.mulf %43, %46 : vector<32x128xf32>
    %c1_39 = arith.constant 1 : index
    %c0_40 = arith.constant 0 : index
    %c0_41 = arith.constant 0 : index
    %48 = vector.load %arg8[%c1_39, %c0_40, %c0_41] : memref<2x1x128xf32, #tpu.memory_space<vmem>>, vector<1x1x128xf32>
    %49 = vector.shape_cast %48 : vector<1x1x128xf32> to vector<1x128xf32>
    %50 = vector.broadcast %49 : vector<1x128xf32> to vector<32x128xf32>
    %51 = arith.addf %47, %50 : vector<32x128xf32>
    %cst_42 = arith.constant 0.000000e+00 : f32
    %52 = vector.broadcast %cst_42 : f32 to vector<32x128xf32>
    %53 = arith.maximumf %51, %52 : vector<32x128xf32>
    %c1_43 = arith.constant 1 : index
    %c0_44 = arith.constant 0 : index
    %c0_45 = arith.constant 0 : index
    %54 = vector.load %arg9[%c1_43, %c0_44, %c0_45] : memref<2x128x128xf32, #tpu.memory_space<vmem>>, vector<1x128x128xf32>
    %55 = vector.shape_cast %54 : vector<1x128x128xf32> to vector<128x128xf32>
    %cst_46 = arith.constant dense<0.000000e+00> : vector<32x128xf32>
    %56 = tpu.matmul %53, %55, %cst_46 {dimension_numbers = #tpu.dot_dimension_numbers<[1], [0], [0], [1], [0, 0, 1, 1], [], []>} : vector<32x128xf32>, vector<128x128xf32>, vector<32x128xf32> -> vector<32x128xf32>
    %57 = arith.addf %30, %56 : vector<32x128xf32>
    %c0_47 = arith.constant 0 : index
    %c0_48 = arith.constant 0 : index
    %58 = vector.load %arg10[%c0_47, %c0_48] : memref<1x128xf32, #tpu.memory_space<vmem>>, vector<1x128xf32>
    %59 = vector.broadcast %58 : vector<1x128xf32> to vector<32x128xf32>
    %60 = arith.addf %57, %59 : vector<32x128xf32>
    %cst_49 = arith.constant 0.000000e+00 : f32
    %61 = vector.broadcast %cst_49 : f32 to vector<32x128xf32>
    %62 = arith.maximumf %60, %61 : vector<32x128xf32>
    %c0_50 = arith.constant 0 : index
    %c0_51 = arith.constant 0 : index
    %63 = vector.load %arg11[%c0_50, %c0_51] : memref<128x128xf32, #tpu.memory_space<vmem>>, vector<128x128xf32>
    %cst_52 = arith.constant dense<0.000000e+00> : vector<32x128xf32>
    %64 = tpu.matmul %62, %63, %cst_52 {dimension_numbers = #tpu.dot_dimension_numbers<[1], [0], [0], [1], [0, 0, 1, 1], [], []>} : vector<32x128xf32>, vector<128x128xf32>, vector<32x128xf32> -> vector<32x128xf32>
    %c0_53 = arith.constant 0 : index
    %c0_54 = arith.constant 0 : index
    %65 = vector.load %arg12[%c0_53, %c0_54] : memref<1x128xf32, #tpu.memory_space<vmem>>, vector<1x128xf32>
    %66 = vector.broadcast %65 : vector<1x128xf32> to vector<32x128xf32>
    %67 = arith.addf %64, %66 : vector<32x128xf32>
    %68 = vector.shape_cast %67 : vector<32x128xf32> to vector<2x16x128xf32>
    %c0_55 = arith.constant 0 : index
    %c0_56 = arith.constant 0 : index
    %c0_57 = arith.constant 0 : index
    %69 = vector.load %arg13[%c0_55, %c0_56, %c0_57] : memref<2x16x128xf32, #tpu.memory_space<vmem>>, vector<2x16x128xf32>
    tpu.vector_store %arg13[%c0_55, %c0_56, %c0_57], %68 {strides = array<i32>} : memref<2x16x128xf32, #tpu.memory_space<vmem>>, vector<2x16x128xf32>,
    return
  }
  func.func @transform_0(%arg0: i32, %arg1: i32) -> (i32, i32, i32) {
    %c0_i32 = arith.constant 0 : i32
    %c0_i32_0 = arith.constant 0 : i32
    return %arg0, %arg1, %c0_i32 : i32, i32, i32
  }
  func.func @transform_1(%arg0: i32, %arg1: i32) -> (i32, i32) {
    %c0_i32 = arith.constant 0 : i32
    %c0_i32_0 = arith.constant 0 : i32
    %c0_i32_1 = arith.constant 0 : i32
    return %c0_i32, %c0_i32_0 : i32, i32
  }
  func.func @transform_2(%arg0: i32, %arg1: i32) -> (i32, i32, i32) {
    %c0_i32 = arith.constant 0 : i32
    %c0_i32_0 = arith.constant 0 : i32
    %c0_i32_1 = arith.constant 0 : i32
    %c0_i32_2 = arith.constant 0 : i32
    return %c0_i32, %c0_i32_0, %c0_i32_1 : i32, i32, i32
  }
  func.func @transform_3(%arg0: i32, %arg1: i32) -> (i32, i32, i32) {
    %c0_i32 = arith.constant 0 : i32
    %c0_i32_0 = arith.constant 0 : i32
    %c0_i32_1 = arith.constant 0 : i32
    %c0_i32_2 = arith.constant 0 : i32
    return %c0_i32, %c0_i32_0, %c0_i32_1 : i32, i32, i32
  }
  func.func @transform_4(%arg0: i32, %arg1: i32) -> (i32, i32, i32) {
    %c0_i32 = arith.constant 0 : i32
    %c0_i32_0 = arith.constant 0 : i32
    %c0_i32_1 = arith.constant 0 : i32
    %c0_i32_2 = arith.constant 0 : i32
    return %c0_i32, %c0_i32_0, %c0_i32_1 : i32, i32, i32
  }
  func.func @transform_5(%arg0: i32, %arg1: i32) -> (i32, i32, i32) {
    %c0_i32 = arith.constant 0 : i32
    %c0_i32_0 = arith.constant 0 : i32
    %c0_i32_1 = arith.constant 0 : i32
    %c0_i32_2 = arith.constant 0 : i32
    return %c0_i32, %c0_i32_0, %c0_i32_1 : i32, i32, i32
  }
  func.func @transform_6(%arg0: i32, %arg1: i32) -> (i32, i32, i32) {
    %c0_i32 = arith.constant 0 : i32
    %c0_i32_0 = arith.constant 0 : i32
    %c0_i32_1 = arith.constant 0 : i32
    %c0_i32_2 = arith.constant 0 : i32
    return %c0_i32, %c0_i32_0, %c0_i32_1 : i32, i32, i32
  }
  func.func @transform_7(%arg0: i32, %arg1: i32) -> (i32, i32, i32) {
    %c0_i32 = arith.constant 0 : i32
    %c0_i32_0 = arith.constant 0 : i32
    %c0_i32_1 = arith.constant 0 : i32
    %c0_i32_2 = arith.constant 0 : i32
    return %c0_i32, %c0_i32_0, %c0_i32_1 : i32, i32, i32
  }
  func.func @transform_8(%arg0: i32, %arg1: i32) -> (i32, i32) {
    %c0_i32 = arith.constant 0 : i32
    %c0_i32_0 = arith.constant 0 : i32
    %c0_i32_1 = arith.constant 0 : i32
    return %c0_i32, %c0_i32_0 : i32, i32
  }
  func.func @transform_9(%arg0: i32, %arg1: i32) -> (i32, i32) {
    %c0_i32 = arith.constant 0 : i32
    %c0_i32_0 = arith.constant 0 : i32
    %c0_i32_1 = arith.constant 0 : i32
    return %c0_i32, %c0_i32_0 : i32, i32
  }
  func.func @transform_10(%arg0: i32, %arg1: i32) -> (i32, i32) {
    %c0_i32 = arith.constant 0 : i32
    %c0_i32_0 = arith.constant 0 : i32
    %c0_i32_1 = arith.constant 0 : i32
    return %c0_i32, %c0_i32_0 : i32, i32
  }
  func.func @transform_11(%arg0: i32, %arg1: i32) -> (i32, i32, i32) {
    %c0_i32 = arith.constant 0 : i32
    %c0_i32_0 = arith.constant 0 : i32
    return %arg0, %arg1, %c0_i32 : i32, i32, i32
  }
}

</mosaic_0001>

<bundles_post_ra>
// kernel: tpu_custom_call.1
= control target key start
LH: loop header
LB: loop body
LE: loop exit
PB: predicated region body
PF: predicated region fallthrough
CT: control target
= control target key end

     0   :  { %16 = vsyncpa [#allocation3], 0  ;;  %s1816_s0 = inlined_call_operand.hbm [shape: f32[2,16,128], index: 0, kind: input, shape index: {}]   ;;  %s1817_s1 = inlined_call_operand.hbm [shape: f32[128,128], index: 1, kind: input, shape index: {}]   ;;  %s1818_s2 = inlined_call_operand.vmem [shape: f32[2,1,128], index: 2, kind: input, shape index: {}]   ;;  %s1819_s3 = inlined_call_operand.vmem [shape: f32[2,1,128], index: 3, kind: input, shape index: {}]   ;;  %s1820_s4 = inlined_call_operand.hbm [shape: f32[2,128,128], index: 4, kind: input, shape index: {}]   ;;  %s1821_s5 = inlined_call_operand.vmem [shape: f32[2,1,128], index: 5, kind: input, shape index: {}]   ;;  %s1822_s6 = inlined_call_operand.vmem [shape: f32[2,1,128], index: 6, kind: input, shape index: {}]   ;;  %s1823_s7 = inlined_call_operand.hbm [shape: f32[2,128,128], index: 7, kind: input, shape index: {}]   ;;  %s1824_s8 = inlined_call_operand.vmem [shape: f32[1,128], index: 8, kind: input, shape index: {}]   ;;  %s1825_s9 = inlined_call_operand.hbm [shape: f32[128,128], index: 9, kind: input, shape index: {}]   ;;  %s1826_s10 = inlined_call_operand.vmem [shape: f32[1,128], index: 10, kind: input, shape index: {}]   ;;  %s1827_s11 = inlined_call_operand.hbm [shape: f32[2,16,128], index: 11, kind: output, shape index: {}]  }
   0x1   :  { %17 = vsyncpa [#allocation6], 0 }
   0x2   :  { %18 = vsyncpa [#allocation9], 0 }
   0x3   :  { %19 = vsyncpa [#allocation4], 0  ;;  %s1582_s17 = smov [#allocation5]   ;;  %s1583_s19 = smov [#allocation8]  }
   0x4   :  { %s37_s18 = sshll.u32 %s1582_s17, 4  ;;  %s69_s20 = sshll.u32 %s1583_s19, 4  ;;  %s38_s18 = int_to_ptr.vmem [resolvable:$true] %s37_s18  ;;  %s1650_s20 = int_to_ptr.vmem [resolvable:$true] %s69_s20 }
   0x5   :  { %s1442_s23 = scalar_lea.hbm %s1817_s1, 2048 }
   0x6   :  { %p1443_p0 = scmp.ne.s32.totalorder %s1817_s1, %s1442_s23  ;;  %p1446_p1 = scmp.lt.u32.totalorder %s1442_s23, %s1817_s1 }
   0x8   :  { %p1448_p2 = pnand %p1446_p1, %p1443_p0 }
   0xa   :  { %1451 = shalt.err (!%p1448_p2)
}
   0xb   :  { %s1452_s28 = scalar_lea.vmem %s38_s18, 2048  ;;  %p1457_p4 = scmp.lt.s32.totalorder %s38_s18, %s38_s18 }
   0xc   :  { %p1453_p3 = scmp.ne.s32.totalorder %s38_s18, %s1452_s28  ;;  %p1458_p5 = scmp.lt.s32.totalorder %s1452_s28, %s1452_s28 }
   0xe   :  { %p1459_p6 = por %p1458_p5, %p1457_p4 }
  0x10   :  { %p1460_p7 = pnand %p1459_p6, %p1453_p3 }
  0x12   :  { %1463 = shalt.err (!%p1460_p7)
}
  0x13   :  { %s1584_s29 = smov 128   ;;  %s1585_s30 = smov 8  }
  0x14   :  { %43 = dma.hbm_to_vmem [thread:$0]  %s1817_s1, 2048, %s38_s18, [#allocation6], %s1584_s29, %s1584_s29, %s1585_s30  }
  0x15   :  { %s1464_s16 = scalar_lea.hbm %s1823_s7, 4096 }
  0x16   :  { %p1465_p8 = scmp.ne.s32.totalorder %s1823_s7, %s1464_s16  ;;  %p1468_p9 = scmp.lt.u32.totalorder %s1464_s16, %s1823_s7 }
  0x18   :  { %p1470_p10 = pnand %p1468_p9, %p1465_p8 }
  0x1a   :  { %1473 = shalt.err (!%p1470_p10)
}
  0x1b   :  { %s1474_s23 = scalar_lea.vmem %s1650_s20, 4096  ;;  %p1479_p12 = scmp.lt.s32.totalorder %s1650_s20, %s1650_s20 }
  0x1c   :  { %p1475_p11 = scmp.ne.s32.totalorder %s1650_s20, %s1474_s23  ;;  %p1480_p13 = scmp.lt.s32.totalorder %s1474_s23, %s1474_s23 }
  0x1e   :  { %p1481_p0 = por %p1480_p13, %p1479_p12 }
  0x20   :  { %p1482_p1 = pnand %p1481_p0, %p1475_p11 }
  0x22   :  { %1485 = shalt.err (!%p1482_p1)
}
  0x23   :  { %75 = dma.hbm_to_vmem [thread:$0]  %s1823_s7, 4096, %s1650_s20, [#allocation9], %s1584_s29, %s1584_s29, %s1585_s30  }
  0x24   :  { %s1586_s24 = smov [#allocation2]   ;;  %s1587_s26 = smov [#allocation7]  }
  0x25   :  { %s25_s25 = sshll.u32 %s1586_s24, 4  ;;  %s53_s27 = sshll.u32 %s1587_s26, 4  ;;  %s26_s25 = int_to_ptr.vmem [resolvable:$true] %s25_s25  ;;  %s1687_s27 = int_to_ptr.vmem [resolvable:$true] %s53_s27 }
  0x26   :  { %s1486_s13 = scalar_lea.hbm %s1816_s0, 512 }
  0x27   :  { %p1487_p2 = scmp.ne.s32.totalorder %s1816_s0, %s1486_s13  ;;  %p1490_p3 = scmp.lt.u32.totalorder %s1486_s13, %s1816_s0 }
  0x29   :  { %p1492_p4 = pnand %p1490_p3, %p1487_p2 }
  0x2b   :  { %1495 = shalt.err (!%p1492_p4)
}
  0x2c   :  { %s1496_s7 = scalar_lea.vmem %s26_s25, 512  ;;  %p1501_p6 = scmp.lt.s32.totalorder %s26_s25, %s26_s25 }
  0x2d   :  { %p1497_p5 = scmp.ne.s32.totalorder %s26_s25, %s1496_s7  ;;  %p1502_p7 = scmp.lt.s32.totalorder %s1496_s7, %s1496_s7 }
  0x2f   :  { %p1503_p8 = por %p1502_p7, %p1501_p6 }
  0x31   :  { %p1504_p9 = pnand %p1503_p8, %p1497_p5 }
  0x33   :  { %1507 = shalt.err (!%p1504_p9)
}
  0x34   :  { %31 = dma.hbm_to_vmem [thread:$0]  %s1816_s0, 512, %s26_s25, [#allocation3], %s1584_s29, %s1584_s29, %s1585_s30  }
  0x35   :  { %s1508_s23 = scalar_lea.hbm %s1820_s4, 4096 }
  0x36   :  { %p1509_p10 = scmp.ne.s32.totalorder %s1820_s4, %s1508_s23  ;;  %p1512_p11 = scmp.lt.u32.totalorder %s1508_s23, %s1820_s4 }
  0x38   :  { %p1514_p12 = pnand %p1512_p11, %p1509_p10 }
  0x3a   :  { %1517 = shalt.err (!%p1514_p12)
}
  0x3b   :  { %s1518_s28 = scalar_lea.vmem %s1687_s27, 4096  ;;  %p1523_p0 = scmp.lt.s32.totalorder %s1687_s27, %s1687_s27 }
  0x3c   :  { %p1519_p13 = scmp.ne.s32.totalorder %s1687_s27, %s1518_s28  ;;  %p1524_p1 = scmp.lt.s32.totalorder %s1518_s28, %s1518_s28 }
  0x3e   :  { %p1525_p2 = por %p1524_p1, %p1523_p0 }
  0x40   :  { %p1526_p3 = pnand %p1525_p2, %p1519_p13 }
  0x42   :  { %1529 = shalt.err (!%p1526_p3)
}
  0x43   :  { %59 = dma.hbm_to_vmem [thread:$0]  %s1820_s4, 4096, %s1687_s27, [#allocation6], %s1584_s29, %s1584_s29, %s1585_s30  }
  0x44   :  { %s1588_s12 = smov [#allocation10]   ;;  %s1530_s16 = scalar_lea.hbm %s1825_s9, 2048 }
  0x45   :  { %s83_s13 = sshll.u32 %s1588_s12, 4  ;;  %p1531_p4 = scmp.ne.s32.totalorder %s1825_s9, %s1530_s16  ;;  %s84_s13 = int_to_ptr.vmem [resolvable:$true] %s83_s13 }
  0x46   :  { %p1534_p5 = scmp.lt.u32.totalorder %s1530_s16, %s1825_s9 }
  0x48   :  { %p1536_p6 = pnand %p1534_p5, %p1531_p4 }
  0x4a   :  { %1539 = shalt.err (!%p1536_p6)
}
  0x4b   :  { %s1540_s21 = scalar_lea.vmem %s84_s13, 2048  ;;  %p1545_p8 = scmp.lt.s32.totalorder %s84_s13, %s84_s13 }
  0x4c   :  { %p1541_p7 = scmp.ne.s32.totalorder %s84_s13, %s1540_s21  ;;  %p1546_p9 = scmp.lt.s32.totalorder %s1540_s21, %s1540_s21 }
  0x4e   :  { %p1547_p10 = por %p1546_p9, %p1545_p8 }
  0x50   :  { %p1548_p11 = pnand %p1547_p10, %p1541_p7 }
  0x52   :  { %1551 = shalt.err (!%p1548_p11)
}
  0x53   :  { %89 = dma.hbm_to_vmem [thread:$0]  %s1825_s9, 2048, %s84_s13, [#allocation9], %s1584_s29, %s1584_s29, %s1585_s30  }
  0x54   :  { %1574 = dma.done.wait [#allocation3], 512  }
  0x55   :  { %1575 = vsyncadd [#allocation3], 4294966784 }
  0x56   :  { %1576 = dma.done.wait [#allocation6], 6144  }
  0x57   :  { %1577 = vsyncadd [#allocation6], 4294961152 }
  0x58   :  { %1578 = dma.done.wait [#allocation9], 6144  }
  0x59   :  { %1579 = vsyncadd [#allocation9], 4294961152  ;;  %v111_v0 = vld [vmem:[#allocation5] sm:$0xff]  ;;  %v112_v1 = vld [vmem:[#allocation5 + $0x8] sm:$0xff]  ;;  %s1589_s17 = smov [#allocation11]  }
  0x5a   :  { %v113_v2 = vld [vmem:[#allocation5 + $0x10] sm:$0xff]  ;;  %v1242_v3 = vpack.c.bf16 %v112_v1, %v111_v0  ;;  %v114_v4 = vld [vmem:[#allocation5 + $0x18] sm:$0xff]  ;;  %v115_v6 = vld [vmem:[#allocation5 + $0x20] sm:$0xff]  ;;  %s866_s7 = sshll.u32 %s1589_s17, 4  ;;  %s867_s7 = int_to_ptr.vmem [resolvable:$true] %s866_s7 }
  0x5b   :  { %v1246_v5 = vpack.c.bf16 %v114_v4, %v113_v2  ;;  %v116_v7 = vld [vmem:[#allocation5 + $0x28] sm:$0xff]  ;;  %v107_v9 = vld [vmem:[#allocation2] sm:$0xff]  ;;  %v117_v10 = vld [vmem:[#allocation5 + $0x30] sm:$0xff]  ;;  %s1552_s20 = scalar_lea.vmem %s867_s7, 512  ;;  %p1557_p13 = scmp.lt.s32.totalorder %s867_s7, %s867_s7 }
  0x5c   :  { %1243 = vmatprep.subr.bf16.mxu0 %v1242_v3  ;;  %v1250_v8 = vpack.c.bf16 %v116_v7, %v115_v6  ;;  %v118_v11 = vld [vmem:[#allocation5 + $0x38] sm:$0xff]  ;;  %1046 = vmatprep.mubr.f32.mxu0 %v107_v9  ;;  %v238_v12 = vld [vmem:[#allocation7] sm:$0xff]  ;;  %v239_v13 = vld [vmem:[#allocation7 + $0x8] sm:$0xff]  ;;  %p1553_p12 = scmp.ne.s32.totalorder %s867_s7, %s1552_s20  ;;  %p1558_p0 = scmp.lt.s32.totalorder %s1552_s20, %s1552_s20 }
  0x5d   :  { %1245 = vmatpush3.bf16.msra.mxu0 %v1242_v3  ;;  %v240_v14 = vld [vmem:[#allocation7 + $0x10] sm:$0xff]  ;;  %v241_v15 = vld [vmem:[#allocation7 + $0x18] sm:$0xff]  ;;  %v1274_v16 = vpack.c.bf16 %v239_v13, %v238_v12  ;;  %v1254_v18 = vpack.c.bf16 %v118_v11, %v117_v10  ;;  %v242_v19 = vld [vmem:[#allocation7 + $0x20] sm:$0xff] }
  0x5e   :  { %1247 = vmatprep.subr.bf16.mxu0 %v1246_v5  ;;  %v1278_v17 = vpack.c.bf16 %v241_v15, %v240_v14  ;;  %v243_v20 = vld [vmem:[#allocation7 + $0x28] sm:$0xff]  ;;  %v119_v21 = vld [vmem:[#allocation5 + $0x40] sm:$0xff]  ;;  %v244_v25 = vld [vmem:[#allocation7 + $0x30] sm:$0xff]  ;;  %p1559_p1 = por %p1558_p0, %p1557_p13 }
  0x5f   :  { %v120_v22 = vld [vmem:[#allocation5 + $0x48] sm:$0xff]  ;;  %1275 = vmatprep.subr.bf16.mxu1 %v1274_v16  ;;  %v1282_v23 = vpack.c.bf16 %v243_v20, %v242_v19  ;;  %v245_v26 = vld [vmem:[#allocation7 + $0x38] sm:$0xff]  ;;  %v121_v27 = vld [vmem:[#allocation5 + $0x50] sm:$0xff] }
  0x60   :  { %1277 = vmatpush3.bf16.msra.mxu1 %v1274_v16  ;;  %v1258_v24 = vpack.c.bf16 %v120_v22, %v119_v21  ;;  %v122_v28 = vld [vmem:[#allocation5 + $0x58] sm:$0xff]  ;;  %v1286_v29 = vpack.c.bf16 %v245_v26, %v244_v25  ;;  %v246_v31 = vld [vmem:[#allocation7 + $0x40] sm:$0xff]  ;;  %v247_v32 = vld [vmem:[#allocation7 + $0x48] sm:$0xff]  ;;  %p1560_p2 = pnand %p1559_p1, %p1553_p12 }
  0x61   :  { %1249 = vmatpush3.bf16.msra.mxu0 %v1246_v5  ;;  %1279 = vmatprep.subr.bf16.mxu1 %v1278_v17  ;;  %v1262_v30 = vpack.c.bf16 %v122_v28, %v121_v27  ;;  %v123_v33 = vld [vmem:[#allocation5 + $0x60] sm:$0xff]  ;;  %v124_v34 = vld [vmem:[#allocation5 + $0x68] sm:$0xff]  ;;  %v1290_v35 = vpack.c.bf16 %v247_v32, %v246_v31  ;;  %v248_v37 = vld [vmem:[#allocation7 + $0x50] sm:$0xff] }
  0x62   :  { %1251 = vmatprep.subr.bf16.mxu0 %v1250_v8  ;;  %v1266_v36 = vpack.c.bf16 %v124_v34, %v123_v33  ;;  %v249_v38 = vld [vmem:[#allocation7 + $0x58] sm:$0xff]  ;;  %v125_v39 = vld [vmem:[#allocation5 + $0x70] sm:$0xff]  ;;  %v108_v43 = vld [vmem:[#allocation2 + $0x8] sm:$0xff] }
  0x63   :  { %v126_v40 = vld [vmem:[#allocation5 + $0x78] sm:$0xff]  ;;  %v1294_v41 = vpack.c.bf16 %v249_v38, %v248_v37  ;;  %v109_v44 = vld [vmem:[#allocation2 + $0x10] sm:$0xff]  ;;  %v250_v46 = vld [vmem:[#allocation7 + $0x60] sm:$0xff] }
  0x64   :  { %1281 = vmatpush3.bf16.msra.mxu1 %v1278_v17  ;;  %v1270_v42 = vpack.c.bf16 %v126_v40, %v125_v39  ;;  %v110_v45 = vld [vmem:[#allocation2 + $0x18] sm:$0xff]  ;;  %v251_v47 = vld [vmem:[#allocation7 + $0x68] sm:$0xff]  ;;  %v252_v49 = vld [vmem:[#allocation7 + $0x70] sm:$0xff] }
  0x65   :  { %1253 = vmatpush3.bf16.msra.mxu0 %v1250_v8  ;;  %1283 = vmatprep.subr.bf16.mxu1 %v1282_v23  ;;  %v1298_v48 = vpack.c.bf16 %v251_v47, %v250_v46  ;;  %v253_v50 = vld [vmem:[#allocation7 + $0x78] sm:$0xff]  ;;  %v365_v52 = vld [vmem:[#allocation8] sm:$0xff]  ;;  %v366_v53 = vld [vmem:[#allocation8 + $0x8] sm:$0xff] }
  0x66   :  { %1255 = vmatprep.subr.bf16.mxu0 %v1254_v18  ;;  %v1302_v51 = vpack.c.bf16 %v253_v50, %v252_v49  ;;  %v367_v54 = vld [vmem:[#allocation8 + $0x10] sm:$0xff]  ;;  %v1306_v55 = vpack.c.bf16 %v366_v53, %v365_v52  ;;  %v368_v56 = vld [vmem:[#allocation8 + $0x18] sm:$0xff]  ;;  %v369_v58 = vld [vmem:[#allocation8 + $0x20] sm:$0xff] }
  0x67   :  { %v1310_v57 = vpack.c.bf16 %v368_v56, %v367_v54  ;;  %v370_v59 = vld [vmem:[#allocation8 + $0x28] sm:$0xff]  ;;  %v371_v61 = vld [vmem:[#allocation8 + $0x30] sm:$0xff]  ;;  %v372_v62 = vld [vmem:[#allocation8 + $0x38] sm:$0xff] }
  0x68   :  { %1285 = vmatpush3.bf16.msra.mxu1 %v1282_v23  ;;  %v1314_v60 = vpack.c.bf16 %v370_v59, %v369_v58  ;;  %v1318_v63 = vpack.c.bf16 %v372_v62, %v371_v61  ;;  %v373_v0 = vld [vmem:[#allocation8 + $0x40] sm:$0xff]  ;;  %v374_v1 = vld [vmem:[#allocation8 + $0x48] sm:$0xff]  ;;  %v375_v3 = vld [vmem:[#allocation8 + $0x50] sm:$0xff] }
  0x69   :  { %1257 = vmatpush3.bf16.msra.mxu0 %v1254_v18  ;;  %1287 = vmatprep.subr.bf16.mxu1 %v1286_v29  ;;  %v1322_v2 = vpack.c.bf16 %v374_v1, %v373_v0  ;;  %v376_v4 = vld [vmem:[#allocation8 + $0x58] sm:$0xff]  ;;  %v880_v6 = vld [vmem:[%s1818_s2] ss:$0 sm:$0xff]  ;;  %v378_v25 = vld [vmem:[#allocation8 + $0x68] sm:$0xff] }
  0x6a   :  { %1259 = vmatprep.subr.bf16.mxu0 %v1258_v24  ;;  %v1326_v5 = vpack.c.bf16 %v376_v4, %v375_v3  ;;  %v881_v8 = vld [vmem:[%s1819_s3] ss:$0 sm:$0xff]  ;;  %v379_v27 = vld [vmem:[#allocation8 + $0x70] sm:$0xff]  ;;  %v380_v28 = vld [vmem:[#allocation8 + $0x78] sm:$0xff] }
  0x6b   :  { %v500_v31 = vld [vmem:[#allocation7 + $0x88] sm:$0xff]  ;;  %v501_v32 = vld [vmem:[#allocation7 + $0x90] sm:$0xff]  ;;  %v502_v34 = vld [vmem:[#allocation7 + $0x98] sm:$0xff] }
  0x6c   :  { %1289 = vmatpush3.bf16.msra.mxu1 %v1286_v29  ;;  %v1334_v29 = vpack.c.bf16 %v380_v28, %v379_v27  ;;  %v504_v37 = vld [vmem:[#allocation7 + $0xa8] sm:$0xff]  ;;  %v505_v39 = vld [vmem:[#allocation7 + $0xb0] sm:$0xff]  ;;  %v506_v40 = vld [vmem:[#allocation7 + $0xb8] sm:$0xff] }
  0x6d   :  { %1261 = vmatpush3.bf16.msra.mxu0 %v1258_v24  ;;  %1291 = vmatprep.subr.bf16.mxu1 %v1290_v35  ;;  %v377_v24 = vld [vmem:[#allocation8 + $0x60] sm:$0xff]  ;;  %v510_v46 = vld [vmem:[#allocation7 + $0xd8] sm:$0xff]  ;;  %v512_v3 = vld [vmem:[#allocation7 + $0xe8] sm:$0xff] }
  0x6e   :  { %1263 = vmatprep.subr.bf16.mxu0 %v1262_v30  ;;  %v1330_v26 = vpack.c.bf16 %v378_v25, %v377_v24  ;;  %v883_v50 = vld [vmem:[%s1822_s6] ss:$0 sm:$0xff]  ;;  %v638_v25 = vld [vmem:[#allocation8 + $0xc8] sm:$0xff]  ;;  %v639_v27 = vld [vmem:[#allocation8 + $0xd0] sm:$0xff] }
  0x6f   :  { %v637_v24 = vld [vmem:[#allocation8 + $0xc0] sm:$0xff]  ;;  %v640_v28 = vld [vmem:[#allocation8 + $0xd8] sm:$0xff] }
  0x70   :  { %1293 = vmatpush3.bf16.msra.mxu1 %v1290_v35  ;;  %v1342_v35 = vpack.c.bf16 %v502_v34, %v501_v32  ;;  %v887_v34 = vld [vmem:[%s1819_s3 + $0x1] ss:$0 sm:$0xff] }
  0x71   :  { %1265 = vmatpush3.bf16.msra.mxu0 %v1262_v30  ;;  %1295 = vmatprep.subr.bf16.mxu1 %v1294_v41  ;;  %v499_v30 = vld [vmem:[#allocation7 + $0x80] sm:$0xff] }
  0x72   :  { %1267 = vmatprep.subr.bf16.mxu0 %v1266_v36  ;;  %v1338_v33 = vpack.c.bf16 %v500_v31, %v499_v30  ;;  %v885_v31 = vld [vmem:[%s1818_s2 + $0x1] ss:$0 sm:$0xff] }
  0x74   :  { %1297 = vmatpush3.bf16.msra.mxu1 %v1294_v41  ;;  %v1350_v41 = vpack.c.bf16 %v506_v40, %v505_v39 }
  0x75   :  { %1269 = vmatpush3.bf16.msra.mxu0 %v1266_v36  ;;  %1299 = vmatprep.subr.bf16.mxu1 %v1298_v48  ;;  %v503_v36 = vld [vmem:[#allocation7 + $0xa0] sm:$0xff] }
  0x76   :  { %1271 = vmatprep.subr.bf16.mxu0 %v1270_v42  ;;  %v1346_v38 = vpack.c.bf16 %v504_v37, %v503_v36 }
  0x78   :  { %1301 = vmatpush3.bf16.msra.mxu1 %v1298_v48  ;;  %v882_v48 = vld [vmem:[%s1821_s5] ss:$0 sm:$0xff] }
  0x79   :  { %1273 = vmatpush3.bf16.msra.mxu0 %v1270_v42  ;;  %1303 = vmatprep.subr.bf16.mxu1 %v1302_v51  ;;  %v507_v42 = vld [vmem:[#allocation7 + $0xc0] sm:$0xff] }
  0x7a   :  { %1307 = vmatprep.subr.bf16.mxu0 %v1306_v55 }
  0x7c   :  { %1047 = vmatmul.mubr.f32.vlgmr.msra.gmra.mrb[0].mxu0 %v108_v43  ;;  %1305 = vmatpush3.bf16.msra.mxu1 %v1302_v51  ;;  %v508_v43 = vld [vmem:[#allocation7 + $0xc8] sm:$0xff] }
  0x7d   :  { %1049 = vmatprep.mubr.f32.mxu0 %v109_v44  ;;  %1309 = vmatpush3.bf16.msra.mxu0 %v1306_v55  ;;  %v1354_v44 = vpack.c.bf16 %v508_v43, %v507_v42 }
  0x7e   :  { %1311 = vmatprep.subr.bf16.mxu0 %v1310_v57  ;;  %1339 = vmatprep.subr.bf16.mxu1 %v1338_v33 }
  0x80   :  { %1050 = vmatmul.mubr.f32.gmra.mrb[2].mxu0 %v110_v45  ;;  %v509_v45 = vld [vmem:[#allocation7 + $0xd0] sm:$0xff] }
  0x81   :  { %1313 = vmatpush3.bf16.msra.mxu0 %v1310_v57  ;;  %v1358_v47 = vpack.c.bf16 %v510_v46, %v509_v45 }
  0x82   :  { %1315 = vmatprep.subr.bf16.mxu0 %v1314_v60 }
  0x85   :  { %1317 = vmatpush3.bf16.msra.mxu0 %v1314_v60 }
  0x86   :  { %1319 = vmatprep.subr.bf16.mxu0 %v1318_v63 }
  0x89   :  { %1321 = vmatpush3.bf16.msra.mxu0 %v1318_v63 }
  0x8a   :  { %1323 = vmatprep.subr.bf16.mxu0 %v1322_v2 }
  0x8d   :  { %1325 = vmatpush3.bf16.msra.mxu0 %v1322_v2  ;;  %v511_v2 = vld [vmem:[#allocation7 + $0xe0] sm:$0xff] }
  0x8e   :  { %1327 = vmatprep.subr.bf16.mxu0 %v1326_v5  ;;  %v1362_v4 = vpack.c.bf16 %v512_v3, %v511_v2  ;;  %v757_v2 = vld [vmem:[#allocation10 + $0x40] sm:$0xff]  ;;  %v758_v3 = vld [vmem:[#allocation10 + $0x48] sm:$0xff] }
  0x91   :  { %1329 = vmatpush3.bf16.msra.mxu0 %v1326_v5  ;;  %v513_v5 = vld [vmem:[#allocation7 + $0xf0] sm:$0xff] }
  0x92   :  { %1331 = vmatprep.subr.bf16.mxu0 %v1330_v26 }
  0x95   :  { %1333 = vmatpush3.bf16.msra.mxu0 %v1330_v26  ;;  %v1386_v26 = vpack.c.bf16 %v638_v25, %v637_v24 }
  0x96   :  { %1335 = vmatprep.subr.bf16.mxu0 %v1334_v29 }
  0x99   :  { %1337 = vmatpush3.bf16.msra.mxu0 %v1334_v29  ;;  %v1390_v29 = vpack.c.bf16 %v640_v28, %v639_v27 }
 0x14f   :  { %v1742_v7 = vpop.f32.mrb[0].mxu0 }
 0x150   :  { %v220_v9 = vmul.f32 %v1742_v7, %v880_v6  ;;  %v1748_v10 = vpop.f32.mrb[1].mxu0 }
 0x151   :  { %v219_v11 = vmul.f32 %v880_v6, %v1748_v10 }
 0x152   :  { %v231_v12 = vadd.f32 %v881_v8, %v220_v9  ;;  %v629_v9 = vld [vmem:[#allocation8 + $0x80] sm:$0xff] }
 0x153   :  { %v1751_v13 = vpop.f32.mrb[2].mxu0  ;;  %v230_v14 = vadd.f32 %v881_v8, %v219_v11  ;;  %v630_v11 = vld [vmem:[#allocation8 + $0x88] sm:$0xff] }
 0x154   :  { %v222_v15 = vmul.f32 %v1751_v13, %v880_v6  ;;  %v1754_v16 = vpop.f32.mrb[3].mxu0  ;;  %v235_v20 = vmax.f32 %v231_v12, 0.0  ;;  %v631_v12 = vld [vmem:[#allocation8 + $0x90] sm:$0xff] }
 0x155   :  { %v221_v17 = vmul.f32 %v880_v6, %v1754_v16  ;;  %v234_v18 = vmax.f32 %v230_v14, 0.0  ;;  %v514_v6 = vld [vmem:[#allocation7 + $0xf8] sm:$0xff]  ;;  %v1370_v14 = vpack.c.bf16 %v630_v11, %v629_v9  ;;  %v889_v9 = vld [vmem:[%s1821_s5 + $0x1] ss:$0 sm:$0xff] }
 0x156   :  { %v233_v19 = vadd.f32 %v881_v8, %v222_v15  ;;  %v632_v15 = vld [vmem:[#allocation8 + $0x98] sm:$0xff] }
 0x157   :  { %v232_v21 = vadd.f32 %v881_v8, %v221_v17  ;;  %1084 = vmatprep.mubr.f32.mxu1 %v234_v18  ;;  %v1366_v8 = vpack.c.bf16 %v514_v6, %v513_v5  ;;  %v1374_v17 = vpack.c.bf16 %v632_v15, %v631_v12  ;;  %v633_v18 = vld [vmem:[#allocation8 + $0xa0] sm:$0xff]  ;;  %1371 = vmatprep.subr.bf16.mxu0 %v1370_v14  ;;  %v759_v5 = vld [vmem:[#allocation10 + $0x50] sm:$0xff]  ;;  %v760_v6 = vld [vmem:[#allocation10 + $0x58] sm:$0xff] }
 0x158   :  { %1085 = vmatmul.mubr.f32.vlgmr.msra.gmra.mrb[0].mxu1 %v235_v20  ;;  %v237_v23 = vmax.f32 %v233_v19, 0.0  ;;  %v634_v19 = vld [vmem:[#allocation8 + $0xa8] sm:$0xff]  ;;  %v891_v12 = vld [vmem:[%s1822_s6 + $0x1] ss:$0 sm:$0xff] }
 0x159   :  { %v236_v22 = vmax.f32 %v232_v21, 0.0  ;;  %1341 = vmatpush3.bf16.msra.mxu1 %v1338_v33  ;;  %v1378_v20 = vpack.c.bf16 %v634_v19, %v633_v18  ;;  %v635_v21 = vld [vmem:[#allocation8 + $0xb0] sm:$0xff] }
 0x15a   :  { %1343 = vmatprep.subr.bf16.mxu1 %v1342_v35 }
 0x15b   :  { %1087 = vmatprep.mubr.f32.mxu1 %v236_v22  ;;  %v636_v22 = vld [vmem:[#allocation8 + $0xb8] sm:$0xff] }
 0x15c   :  { %1088 = vmatmul.mubr.f32.gmra.mrb[2].mxu1 %v237_v23  ;;  %v1382_v23 = vpack.c.bf16 %v636_v22, %v635_v21 }
 0x15d   :  { %1345 = vmatpush3.bf16.msra.mxu1 %v1342_v35 }
 0x15e   :  { %1347 = vmatprep.subr.bf16.mxu1 %v1346_v38 }
 0x161   :  { %1349 = vmatpush3.bf16.msra.mxu1 %v1346_v38 }
 0x162   :  { %1351 = vmatprep.subr.bf16.mxu1 %v1350_v41 }
 0x165   :  { %1353 = vmatpush3.bf16.msra.mxu1 %v1350_v41 }
 0x166   :  { %1355 = vmatprep.subr.bf16.mxu1 %v1354_v44 }
 0x169   :  { %1357 = vmatpush3.bf16.msra.mxu1 %v1354_v44 }
 0x16a   :  { %1359 = vmatprep.subr.bf16.mxu1 %v1358_v47 }
 0x16d   :  { %1361 = vmatpush3.bf16.msra.mxu1 %v1358_v47 }
 0x16e   :  { %1363 = vmatprep.subr.bf16.mxu1 %v1362_v4 }
 0x171   :  { %1365 = vmatpush3.bf16.msra.mxu1 %v1362_v4  ;;  %v1418_v4 = vpack.c.bf16 %v758_v3, %v757_v2 }
 0x172   :  { %1367 = vmatprep.subr.bf16.mxu1 %v1366_v8 }
 0x175   :  { %1369 = vmatpush3.bf16.msra.mxu1 %v1366_v8  ;;  %v1422_v8 = vpack.c.bf16 %v760_v6, %v759_v5 }
 0x22b   :  { %v1086_v49 = vpop.f32.mrb[0].mxu1 }
 0x22c   :  { %v347_v51 = vmul.f32 %v1086_v49, %v882_v48  ;;  %v320_v52 = vpop.f32.mrb[1].mxu1 }
 0x22d   :  { %v346_v53 = vmul.f32 %v882_v48, %v320_v52  ;;  %v644_v52 = vld [vmem:[#allocation8 + $0xf8] sm:$0xff] }
 0x22e   :  { %v358_v54 = vadd.f32 %v883_v50, %v347_v51 }
 0x22f   :  { %v357_v55 = vadd.f32 %v883_v50, %v346_v53  ;;  %v1089_v56 = vpop.f32.mrb[2].mxu1 }
 0x230   :  { %v349_v57 = vmul.f32 %v1089_v56, %v882_v48  ;;  %v330_v58 = vpop.f32.mrb[3].mxu1  ;;  %v362_v61 = vmax.f32 %v358_v54, 0.0  ;;  %v749_v54 = vld [vmem:[#allocation10] sm:$0xff]  ;;  %v751_v56 = vld [vmem:[#allocation10 + $0x10] sm:$0xff] }
 0x231   :  { %v361_v59 = vmax.f32 %v357_v55, 0.0  ;;  %v348_v60 = vmul.f32 %v882_v48, %v330_v58  ;;  %v750_v55 = vld [vmem:[#allocation10 + $0x8] sm:$0xff]  ;;  %v752_v58 = vld [vmem:[#allocation10 + $0x18] sm:$0xff] }
 0x232   :  { %v360_v62 = vadd.f32 %v883_v50, %v349_v57  ;;  %v1402_v57 = vpack.c.bf16 %v750_v55, %v749_v54 }
 0x233   :  { %v359_v63 = vadd.f32 %v883_v50, %v348_v60  ;;  %1122 = vmatprep.mubr.f32.mxu0 %v361_v59  ;;  %v642_v50 = vld [vmem:[#allocation8 + $0xe8] sm:$0xff]  ;;  %v1406_v59 = vpack.c.bf16 %v752_v58, %v751_v56  ;;  %v753_v60 = vld [vmem:[#allocation10 + $0x20] sm:$0xff] }
 0x234   :  { %1123 = vmatmul.mubr.f32.vlgmr.msra.gmra.mrb[4].mxu0 %v362_v61  ;;  %v364_v1 = vmax.f32 %v360_v62, 0.0  ;;  %v754_v61 = vld [vmem:[#allocation10 + $0x28] sm:$0xff]  ;;  %1403 = vmatprep.subr.bf16.mxu1 %v1402_v57 }
 0x235   :  { %v363_v0 = vmax.f32 %v359_v63, 0.0  ;;  %1373 = vmatpush3.bf16.msra.mxu0 %v1370_v14  ;;  %v1410_v62 = vpack.c.bf16 %v754_v61, %v753_v60  ;;  %v755_v63 = vld [vmem:[#allocation10 + $0x30] sm:$0xff] }
 0x236   :  { %1375 = vmatprep.subr.bf16.mxu0 %v1374_v17 }
 0x237   :  { %1125 = vmatprep.mubr.f32.mxu0 %v363_v0  ;;  %v756_v0 = vld [vmem:[#allocation10 + $0x38] sm:$0xff] }
 0x238   :  { %1126 = vmatmul.mubr.f32.gmra.mrb[6].mxu0 %v364_v1  ;;  %v1414_v1 = vpack.c.bf16 %v756_v0, %v755_v63 }
 0x239   :  { %1377 = vmatpush3.bf16.msra.mxu0 %v1374_v17 }
 0x23a   :  { %1379 = vmatprep.subr.bf16.mxu0 %v1378_v20 }
 0x23d   :  { %1381 = vmatpush3.bf16.msra.mxu0 %v1378_v20 }
 0x23e   :  { %1383 = vmatprep.subr.bf16.mxu0 %v1382_v23 }
 0x241   :  { %1385 = vmatpush3.bf16.msra.mxu0 %v1382_v23 }
 0x242   :  { %1387 = vmatprep.subr.bf16.mxu0 %v1386_v26 }
 0x245   :  { %1389 = vmatpush3.bf16.msra.mxu0 %v1386_v26 }
 0x246   :  { %1391 = vmatprep.subr.bf16.mxu0 %v1390_v29 }
 0x249   :  { %1393 = vmatpush3.bf16.msra.mxu0 %v1390_v29 }
 0x307   :  { %v1124_v30 = vpop.f32.mrb[4].mxu0 }
 0x308   :  { %v1767_v32 = vadd.f32 %v1124_v30, %v1742_v7  ;;  %v447_v33 = vpop.f32.mrb[5].mxu0  ;;  %v761_v30 = vld [vmem:[#allocation10 + $0x60] sm:$0xff] }
 0x309   :  { %v1773_v35 = vadd.f32 %v447_v33, %v1748_v10 }
 0x30a   :  { %v479_v36 = vmul.f32 %v885_v31, %v1767_v32 }
 0x30b   :  { %v478_v37 = vmul.f32 %v885_v31, %v1773_v35  ;;  %v1127_v38 = vpop.f32.mrb[6].mxu0 }
 0x30c   :  { %v491_v39 = vadd.f32 %v887_v34, %v479_v36  ;;  %v1778_v40 = vadd.f32 %v1127_v38, %v1751_v13  ;;  %v457_v41 = vpop.f32.mrb[7].mxu0  ;;  %v641_v13 = vld [vmem:[#allocation8 + $0xe0] sm:$0xff]  ;;  %v764_v36 = vld [vmem:[#allocation10 + $0x78] sm:$0xff] }
 0x30d   :  { %v1781_v7 = vadd.f32 %v457_v41, %v1754_v16  ;;  %v490_v42 = vadd.f32 %v887_v34, %v478_v37  ;;  %v1394_v51 = vpack.c.bf16 %v642_v50, %v641_v13  ;;  %v643_v16 = vld [vmem:[#allocation8 + $0xf0] sm:$0xff] }
 0x30e   :  { %v481_v43 = vmul.f32 %v885_v31, %v1778_v40  ;;  %v495_v45 = vmax.f32 %v491_v39, 0.0  ;;  %v1398_v53 = vpack.c.bf16 %v644_v52, %v643_v16  ;;  %v892_v39 = vld [vmem:[%s1824_s8] ss:$0 sm:$0xff] }
 0x30f   :  { %v480_v44 = vmul.f32 %v885_v31, %v1781_v7  ;;  %v494_v10 = vmax.f32 %v490_v42, 0.0  ;;  %1395 = vmatprep.subr.bf16.mxu0 %v1394_v51  ;;  %v762_v31 = vld [vmem:[#allocation10 + $0x68] sm:$0xff] }
 0x310   :  { %v493_v46 = vadd.f32 %v887_v34, %v481_v43  ;;  %1397 = vmatpush3.bf16.msra.mxu0 %v1394_v51  ;;  %v1426_v33 = vpack.c.bf16 %v762_v31, %v761_v30 }
 0x311   :  { %1160 = vmatprep.mubr.f32.mxu1 %v494_v10  ;;  %v492_v47 = vadd.f32 %v887_v34, %v480_v44  ;;  %1399 = vmatprep.subr.bf16.mxu0 %v1398_v53  ;;  %v763_v34 = vld [vmem:[#allocation10 + $0x70] sm:$0xff] }
 0x312   :  { %1161 = vmatmul.mubr.f32.vlgmr.msra.gmra.mrb[4].mxu1 %v495_v45  ;;  %v497_v49 = vmax.f32 %v493_v46, 0.0  ;;  %v1430_v37 = vpack.c.bf16 %v764_v36, %v763_v34 }
 0x313   :  { %v496_v48 = vmax.f32 %v492_v47, 0.0  ;;  %1405 = vmatpush3.bf16.msra.mxu1 %v1402_v57 }
 0x314   :  { %1401 = vmatpush3.bf16.msra.mxu0 %v1398_v53  ;;  %1407 = vmatprep.subr.bf16.mxu1 %v1406_v59 }
 0x315   :  { %1163 = vmatprep.mubr.f32.mxu1 %v496_v48 }
 0x316   :  { %1164 = vmatmul.mubr.f32.gmra.mrb[6].mxu1 %v497_v49 }
 0x317   :  { %1409 = vmatpush3.bf16.msra.mxu1 %v1406_v59 }
 0x318   :  { %1411 = vmatprep.subr.bf16.mxu1 %v1410_v62 }
 0x31b   :  { %1413 = vmatpush3.bf16.msra.mxu1 %v1410_v62 }
 0x31c   :  { %1415 = vmatprep.subr.bf16.mxu1 %v1414_v1 }
 0x31f   :  { %1417 = vmatpush3.bf16.msra.mxu1 %v1414_v1 }
 0x320   :  { %1419 = vmatprep.subr.bf16.mxu1 %v1418_v4 }
 0x323   :  { %1421 = vmatpush3.bf16.msra.mxu1 %v1418_v4 }
 0x324   :  { %1423 = vmatprep.subr.bf16.mxu1 %v1422_v8 }
 0x327   :  { %1425 = vmatpush3.bf16.msra.mxu1 %v1422_v8 }
 0x328   :  { %1427 = vmatprep.subr.bf16.mxu1 %v1426_v33 }
 0x32b   :  { %1429 = vmatpush3.bf16.msra.mxu1 %v1426_v33 }
 0x32c   :  { %1431 = vmatprep.subr.bf16.mxu1 %v1430_v37 }
 0x32f   :  { %1433 = vmatpush3.bf16.msra.mxu1 %v1430_v37 }
 0x3e5   :  { %v1162_v11 = vpop.f32.mrb[4].mxu1 }
 0x3e6   :  { %v609_v14 = vmul.f32 %v1162_v11, %v889_v9  ;;  %v581_v15 = vpop.f32.mrb[5].mxu1 }
 0x3e7   :  { %v608_v17 = vmul.f32 %v889_v9, %v581_v15 }
 0x3e8   :  { %v621_v18 = vadd.f32 %v891_v12, %v609_v14 }
 0x3e9   :  { %v620_v19 = vadd.f32 %v891_v12, %v608_v17  ;;  %v1165_v20 = vpop.f32.mrb[6].mxu1 }
 0x3ea   :  { %v611_v21 = vmul.f32 %v1165_v20, %v889_v9  ;;  %v591_v22 = vpop.f32.mrb[7].mxu1  ;;  %v625_v25 = vmax.f32 %v621_v18, 0.0 }
 0x3eb   :  { %v624_v23 = vmax.f32 %v620_v19, 0.0  ;;  %v610_v24 = vmul.f32 %v889_v9, %v591_v22 }
 0x3ec   :  { %v623_v26 = vadd.f32 %v891_v12, %v611_v21 }
 0x3ed   :  { %v622_v27 = vadd.f32 %v891_v12, %v610_v24  ;;  %1198 = vmatprep.mubr.f32.mxu0 %v624_v23 }
 0x3ee   :  { %1199 = vmatmul.mubr.f32.vlgmr.msra.gmra.mrb[8].mxu0 %v625_v25  ;;  %v627_v29 = vmax.f32 %v623_v26, 0.0 }
 0x3ef   :  { %v626_v28 = vmax.f32 %v622_v27, 0.0 }
 0x3f1   :  { %1201 = vmatprep.mubr.f32.mxu0 %v626_v28 }
 0x3f2   :  { %1202 = vmatmul.mubr.f32.gmra.mrb[10].mxu0 %v627_v29 }
 0x4c1   :  { %v1200_v38 = vpop.f32.mrb[8].mxu0 }
 0x4c2   :  { %v731_v41 = vadd.f32 %v1200_v38, %v1767_v32  ;;  %v711_v42 = vpop.f32.mrb[9].mxu0  ;;  %v893_v32 = vld [vmem:[%s1826_s10] ss:$0 sm:$0xff] }
 0x4c3   :  { %v730_v43 = vadd.f32 %v711_v42, %v1773_v35 }
 0x4c4   :  { %v742_v44 = vadd.f32 %v892_v39, %v731_v41 }
 0x4c5   :  { %v741_v10 = vadd.f32 %v892_v39, %v730_v43  ;;  %v1203_v45 = vpop.f32.mrb[10].mxu0 }
 0x4c6   :  { %v733_v46 = vadd.f32 %v1203_v45, %v1778_v40  ;;  %v721_v47 = vpop.f32.mrb[11].mxu0  ;;  %v746_v13 = vmax.f32 %v742_v44, 0.0 }
 0x4c7   :  { %v745_v48 = vmax.f32 %v741_v10, 0.0  ;;  %v732_v49 = vadd.f32 %v721_v47, %v1781_v7 }
 0x4c8   :  { %v744_v50 = vadd.f32 %v892_v39, %v733_v46 }
 0x4c9   :  { %v743_v51 = vadd.f32 %v892_v39, %v732_v49  ;;  %1236 = vmatprep.mubr.f32.mxu1 %v745_v48 }
 0x4ca   :  { %1237 = vmatmul.mubr.f32.vlgmr.msra.gmra.mrb[8].mxu1 %v746_v13  ;;  %v748_v52 = vmax.f32 %v744_v50, 0.0 }
 0x4cb   :  { %v747_v16 = vmax.f32 %v743_v51, 0.0 }
 0x4cd   :  { %1239 = vmatprep.mubr.f32.mxu1 %v747_v16 }
 0x4ce   :  { %1240 = vmatmul.mubr.f32.gmra.mrb[10].mxu1 %v748_v52 }
 0x59d   :  { %v1238_v35 = vpop.f32.mrb[8].mxu1 }
 0x59e   :  { %v844_v53 = vadd.f32 %v1238_v35, %v893_v32  ;;  %v838_v40 = vpop.f32.mrb[9].mxu1 }
 0x59f   :  { %v839_v54 = vadd.f32 %v893_v32, %v838_v40 }
 0x5a0   :  { %858 = vst [vmem:[#allocation11 + $0x8] sm:$0xff] %v844_v53 }
 0x5a1   :  { %857 = vst [vmem:[#allocation11] sm:$0xff] %v839_v54  ;;  %v1241_v7 = vpop.f32.mrb[10].mxu1 }
 0x5a2   :  { %v854_v55 = vadd.f32 %v1241_v7, %v893_v32  ;;  %v848_v56 = vpop.f32.mrb[11].mxu1 }
 0x5a3   :  { %v849_v57 = vadd.f32 %v893_v32, %v848_v56 }
 0x5a4   :  { %860 = vst [vmem:[#allocation11 + $0x18] sm:$0xff] %v854_v55 }
 0x5a5   :  { %859 = vst [vmem:[#allocation11 + $0x10] sm:$0xff] %v849_v57 }
 0x5a6   :  { %1563 = shalt.err (!%p1560_p2)
}
 0x5a7   :  { %s1564_s21 = scalar_lea.hbm %s1827_s11, 512 }
 0x5a8   :  { %p1565_p3 = scmp.ne.s32.totalorder %s1827_s11, %s1564_s21  ;;  %p1568_p4 = scmp.lt.u32.totalorder %s1564_s21, %s1827_s11 }
 0x5aa   :  { %p1570_p5 = pnand %p1568_p4, %p1565_p3 }
 0x5ac   :  { %1573 = shalt.err (!%p1570_p5)
}
 0x5ad   :  { %872 = dma.vmem_to_hbm [thread:$0]  %s867_s7, 512, %s1827_s11, [#allocation4], %s1584_s29, %s1584_s29, %s1585_s30  }
 0x5ae   :  { %1580 = dma.done.wait [#allocation4], 512  }
 0x5af   :  { %1581 = vsyncadd [#allocation4], 4294966784 }
 0x5b0   :  { %876 = vsyncpa [#allocation3], 1 }
 0x5b1   :  { %877 = vsyncpa [#allocation6], 1 }
 0x5b2   :  { %878 = vsyncpa [#allocation9], 1 }
 0x5b3   :  { %879 = vsyncpa [#allocation4], 1 }

</bundles_post_ra>
